<compile_context>
chip_gen: v7x
topology: tpu7x:2x2x1
jax: 0.10.0
libtpu: 0.0.40
codegen_flags: <defaults>
</compile_context>

<pallas_src>
import functools

import jax
import jax.numpy as jnp
from jax import lax
from jax.experimental import pallas as pl
from jax.experimental.pallas import tpu as pltpu


def mhsa_kernel(x_ref, wqkv_ref, wproj_ref, bproj_ref, o_ref, *, num_heads):
    x = x_ref[0]                                  # (N, C) f32
    N, C = x.shape
    hd = C // num_heads
    scale = hd ** (-0.5)

    # QKV projection: bf16 x bf16 -> f32 accumulate on the MXU.
    xb = x.astype(jnp.bfloat16)
    qkv = jnp.dot(xb, wqkv_ref[...], preferred_element_type=jnp.float32)   # (N, 3C)

    acc = jnp.zeros((N, C), jnp.float32)          # f32 accumulator for projection
    for h in range(num_heads):                    # static unroll, small head count
        lo = h * hd
        # fold 1/sqrt(hd) into q (cheaper than scaling the (N,N) scores)
        qh = (qkv[:, lo:lo + hd] * scale).astype(jnp.bfloat16)             # (N, hd)
        kh = qkv[:, C + lo:C + lo + hd].astype(jnp.bfloat16)               # (N, hd)
        vh = qkv[:, 2 * C + lo:2 * C + lo + hd].astype(jnp.bfloat16)       # (N, hd)

        # q @ k^T without an explicit transpose: contract the last dims.
        s = lax.dot_general(qh, kh, (((1,), (1,)), ((), ())),
                            preferred_element_type=jnp.float32)            # (N, N)
        s = s - jnp.max(s, axis=-1, keepdims=True)
        p = jnp.exp(s)
        # EUP approx reciprocal instead of a VALU divide.
        p = p * pl.reciprocal(jnp.sum(p, axis=-1, keepdims=True), approx=True)
        # TODO(synk): attention_dropout / projection_dropout are identity (eval mode).

        oh = jnp.dot(p.astype(jnp.bfloat16), vh,
                     preferred_element_type=jnp.float32)                   # (N, hd)

        # Fold this head's output through its hd rows of W_proj and accumulate:
        # equivalent to concat(head_outs) @ W_proj, but with no concat buffer.
        acc = acc + jnp.dot(oh.astype(jnp.bfloat16), wproj_ref[lo:lo + hd, :],
                            preferred_element_type=jnp.float32)            # (N, C)

    o_ref[0] = (acc + bproj_ref[0]).astype(o_ref.dtype)


def mhsa(x, wqkv, wproj, bproj, num_heads):
    """x: (B, N, C) f32.  wqkv: (C, 3C), wproj: (C, C) (pre-transposed vs. PyTorch),
    bproj: (1, C).  Weights are stored as bf16 inside the kernel."""
    B, N, C = x.shape
    assert C % num_heads == 0, "embedding dim must be divisible by num_heads"
    assert wqkv.shape == (C, 3 * C) and wproj.shape == (C, C) and bproj.shape == (1, C)

    kernel = functools.partial(mhsa_kernel, num_heads=num_heads)
    return pl.pallas_call(
        kernel,
        out_shape=jax.ShapeDtypeStruct((B, N, C), x.dtype),
        grid=(B,),
        in_specs=[
            pl.BlockSpec((1, N, C), lambda b: (b, 0, 0)),      # x, one batch row per step
            pl.BlockSpec((C, 3 * C), lambda b: (0, 0)),        # W_qkv (bf16)
            pl.BlockSpec((C, C), lambda b: (0, 0)),            # W_proj (bf16)
            pl.BlockSpec((1, C), lambda b: (0, 0)),            # b_proj (f32)
        ],
        out_specs=pl.BlockSpec((1, N, C), lambda b: (b, 0, 0)),
        compiler_params=pltpu.CompilerParams(
            dimension_semantics=("parallel",),
            vmem_limit_bytes=16 * 1024 * 1024,
        ),
    )(x, wqkv.astype(jnp.bfloat16), wproj.astype(jnp.bfloat16), bproj)


# ---------------- pure-JAX f32 reference (mirrors the PyTorch forward) ----------------
def reference_forward(x, wqkv, wproj, bproj, num_heads):
    B, N, C = x.shape
    hd = C // num_heads
    scale = hd ** (-0.5)
    qkv = (x @ wqkv).reshape(B, N, 3, num_heads, hd).transpose(2, 0, 3, 1, 4)
    q, k, v = qkv[0], qkv[1], qkv[2]                          # (B, H, N, hd)
    s = jnp.einsum("bhnd,bhmd->bhnm", q, k) * scale
    p = jax.nn.softmax(s, axis=-1)
    o = jnp.einsum("bhnm,bhmd->bhnd", p, v)                   # (B, H, N, hd)
    o = o.transpose(0, 2, 1, 3).reshape(B, N, C)
    return o @ wproj + bproj                                  # bias broadcasts (1, C)


if __name__ == "__main__":
    B, N, C, NUM_HEADS = 2, 8, 128, 2   # embedding_dimension=128 (module default)

    key = jax.random.PRNGKey(0)
    k0, k1, k2, k3 = jax.random.split(key, 4)
    wqkv = 0.05 * jax.random.normal(k0, (C, 3 * C), jnp.float32)   # to_qkv.weight.T (no bias)
    wproj = 0.05 * jax.random.normal(k1, (C, C), jnp.float32)      # projection.weight.T
    bproj = 0.05 * jax.random.normal(k2, (1, C), jnp.float32)      # projection.bias
    x = jax.random.normal(k3, (B, N, C), jnp.float32)

    out = jax.block_until_ready(mhsa(x, wqkv, wproj, bproj, NUM_HEADS))
    ref = jax.block_until_ready(reference_forward(x, wqkv, wproj, bproj, NUM_HEADS))

    assert out.shape == (B, N, C)
    # bf16 MXU operands with f32 accumulation -> compare against the f32
    # reference with a bf16-appropriate tolerance.
    max_err = jnp.max(jnp.abs(out - ref))
    assert jnp.allclose(out, ref, atol=3e-2, rtol=3e-2), f"max abs err {max_err}"
    print("KERNEL_OK")
</pallas_src>

<mosaic_0001>
module attributes {stable_mosaic.version = 11 : i64} {
  func.func @mhsa_kernel(%arg0: i32, %arg1: memref<1x8x128xf32, #tpu.memory_space<vmem>>, %arg2: memref<128x384xbf16, #tpu.memory_space<vmem>>, %arg3: memref<128x128xbf16, #tpu.memory_space<vmem>>, %arg4: memref<1x128xf32, #tpu.memory_space<vmem>>, %arg5: memref<1x8x128xf32, #tpu.memory_space<vmem>>) attributes {dimension_semantics = [#tpu.dimension_semantics<parallel>], iteration_bounds = array<i64: 2>, scalar_prefetch = 0 : i64, scratch_operands = 0 : i64, tpu.core_type = #tpu.core_type<tc>, window_params = [{transform_indices = @transform_0, window_bounds = array<i64: 1, 8, 128>}, {pipeline_mode = #tpu.pipeline_mode<synchronous>, transform_indices = @transform_1, window_bounds = array<i64: 128, 384>}, {pipeline_mode = #tpu.pipeline_mode<synchronous>, transform_indices = @transform_2, window_bounds = array<i64: 128, 128>}, {pipeline_mode = #tpu.pipeline_mode<synchronous>, transform_indices = @transform_3, window_bounds = array<i64: 1, 128>}, {transform_indices = @transform_4, window_bounds = array<i64: 1, 8, 128>}]} {
    %c0 = arith.constant 0 : index
    %c0_0 = arith.constant 0 : index
    %c0_1 = arith.constant 0 : index
    %0 = vector.load %arg1[%c0, %c0_0, %c0_1] : memref<1x8x128xf32, #tpu.memory_space<vmem>>, vector<1x8x128xf32>
    %1 = vector.shape_cast %0 : vector<1x8x128xf32> to vector<8x128xf32>
    %2 = arith.truncf %1 : vector<8x128xf32> to vector<8x128xbf16>
    %c0_2 = arith.constant 0 : index
    %c0_3 = arith.constant 0 : index
    %3 = vector.load %arg2[%c0_2, %c0_3] : memref<128x384xbf16, #tpu.memory_space<vmem>>, vector<128x384xbf16>
    %cst = arith.constant dense<0.000000e+00> : vector<8x384xf32>
    %4 = tpu.matmul %2, %3, %cst {dimension_numbers = #tpu.dot_dimension_numbers<[1], [0], [0], [1], [0, 0, 1, 1], [], []>} : vector<8x128xbf16>, vector<128x384xbf16>, vector<8x384xf32> -> vector<8x384xf32>
    %cst_4 = arith.constant 0.000000e+00 : f32
    %5 = vector.broadcast %cst_4 : f32 to vector<8x128xf32>
    %6 = vector.extract_strided_slice %4 {offsets = [0, 0], sizes = [8, 64], strides = [1, 1]} : vector<8x384xf32> to vector<8x64xf32>
    %cst_5 = arith.constant 1.250000e-01 : f32
    %7 = vector.broadcast %cst_5 : f32 to vector<8x64xf32>
    %8 = arith.mulf %6, %7 : vector<8x64xf32>
    %9 = arith.truncf %8 : vector<8x64xf32> to vector<8x64xbf16>
    %10 = vector.extract_strided_slice %4 {offsets = [0, 128], sizes = [8, 64], strides = [1, 1]} : vector<8x384xf32> to vector<8x64xf32>
    %11 = arith.truncf %10 : vector<8x64xf32> to vector<8x64xbf16>
    %12 = vector.extract_strided_slice %4 {offsets = [0, 256], sizes = [8, 64], strides = [1, 1]} : vector<8x384xf32> to vector<8x64xf32>
    %13 = arith.truncf %12 : vector<8x64xf32> to vector<8x64xbf16>
    %cst_6 = arith.constant dense<0.000000e+00> : vector<8x8xf32>
    %14 = tpu.matmul %9, %11, %cst_6 {dimension_numbers = #tpu.dot_dimension_numbers<[1], [1], [0], [0], [0, 0, 1, 0], [], []>} : vector<8x64xbf16>, vector<8x64xbf16>, vector<8x8xf32> -> vector<8x8xf32>
    %cst_7 = arith.constant dense<0xFF800000> : vector<8xf32>
    %15 = vector.multi_reduction <maximumf>, %14, %cst_7 [1] : vector<8x8xf32> to vector<8xf32>
    %16 = vector.shape_cast %15 : vector<8xf32> to vector<8x1xf32>
    %17 = vector.broadcast %16 : vector<8x1xf32> to vector<8x8xf32>
    %18 = arith.subf %14, %17 : vector<8x8xf32>
    %19 = math.exp %18 : vector<8x8xf32>
    %cst_8 = arith.constant dense<0.000000e+00> : vector<8xf32>
    %20 = vector.multi_reduction <add>, %19, %cst_8 [1] : vector<8x8xf32> to vector<8xf32>
    %21 = vector.shape_cast %20 : vector<8xf32> to vector<8x1xf32>
    %22 = tpu.reciprocal %21 {approx = true} : vector<8x1xf32> -> vector<8x1xf32>
    %23 = vector.broadcast %22 : vector<8x1xf32> to vector<8x8xf32>
    %24 = arith.mulf %19, %23 : vector<8x8xf32>
    %25 = arith.truncf %24 : vector<8x8xf32> to vector<8x8xbf16>
    %cst_9 = arith.constant dense<0.000000e+00> : vector<8x64xf32>
    %26 = tpu.matmul %25, %13, %cst_9 {dimension_numbers = #tpu.dot_dimension_numbers<[1], [0], [0], [1], [0, 0, 1, 1], [], []>} : vector<8x8xbf16>, vector<8x64xbf16>, vector<8x64xf32> -> vector<8x64xf32>
    %27 = arith.truncf %26 : vector<8x64xf32> to vector<8x64xbf16>
    %c0_10 = arith.constant 0 : index
    %c0_11 = arith.constant 0 : index
    %28 = vector.load %arg3[%c0_10, %c0_11] : memref<128x128xbf16, #tpu.memory_space<vmem>>, vector<64x128xbf16>
    %cst_12 = arith.constant dense<0.000000e+00> : vector<8x128xf32>
    %29 = tpu.matmul %27, %28, %cst_12 {dimension_numbers = #tpu.dot_dimension_numbers<[1], [0], [0], [1], [0, 0, 1, 1], [], []>} : vector<8x64xbf16>, vector<64x128xbf16>, vector<8x128xf32> -> vector<8x128xf32>
    %30 = arith.addf %5, %29 : vector<8x128xf32>
    %31 = vector.extract_strided_slice %4 {offsets = [0, 64], sizes = [8, 64], strides = [1, 1]} : vector<8x384xf32> to vector<8x64xf32>
    %cst_13 = arith.constant 1.250000e-01 : f32
    %32 = vector.broadcast %cst_13 : f32 to vector<8x64xf32>
    %33 = arith.mulf %31, %32 : vector<8x64xf32>
    %34 = arith.truncf %33 : vector<8x64xf32> to vector<8x64xbf16>
    %35 = vector.extract_strided_slice %4 {offsets = [0, 192], sizes = [8, 64], strides = [1, 1]} : vector<8x384xf32> to vector<8x64xf32>
    %36 = arith.truncf %35 : vector<8x64xf32> to vector<8x64xbf16>
    %37 = vector.extract_strided_slice %4 {offsets = [0, 320], sizes = [8, 64], strides = [1, 1]} : vector<8x384xf32> to vector<8x64xf32>
    %38 = arith.truncf %37 : vector<8x64xf32> to vector<8x64xbf16>
    %cst_14 = arith.constant dense<0.000000e+00> : vector<8x8xf32>
    %39 = tpu.matmul %34, %36, %cst_14 {dimension_numbers = #tpu.dot_dimension_numbers<[1], [1], [0], [0], [0, 0, 1, 0], [], []>} : vector<8x64xbf16>, vector<8x64xbf16>, vector<8x8xf32> -> vector<8x8xf32>
    %cst_15 = arith.constant dense<0xFF800000> : vector<8xf32>
    %40 = vector.multi_reduction <maximumf>, %39, %cst_15 [1] : vector<8x8xf32> to vector<8xf32>
    %41 = vector.shape_cast %40 : vector<8xf32> to vector<8x1xf32>
    %42 = vector.broadcast %41 : vector<8x1xf32> to vector<8x8xf32>
    %43 = arith.subf %39, %42 : vector<8x8xf32>
    %44 = math.exp %43 : vector<8x8xf32>
    %cst_16 = arith.constant dense<0.000000e+00> : vector<8xf32>
    %45 = vector.multi_reduction <add>, %44, %cst_16 [1] : vector<8x8xf32> to vector<8xf32>
    %46 = vector.shape_cast %45 : vector<8xf32> to vector<8x1xf32>
    %47 = tpu.reciprocal %46 {approx = true} : vector<8x1xf32> -> vector<8x1xf32>
    %48 = vector.broadcast %47 : vector<8x1xf32> to vector<8x8xf32>
    %49 = arith.mulf %44, %48 : vector<8x8xf32>
    %50 = arith.truncf %49 : vector<8x8xf32> to vector<8x8xbf16>
    %cst_17 = arith.constant dense<0.000000e+00> : vector<8x64xf32>
    %51 = tpu.matmul %50, %38, %cst_17 {dimension_numbers = #tpu.dot_dimension_numbers<[1], [0], [0], [1], [0, 0, 1, 1], [], []>} : vector<8x8xbf16>, vector<8x64xbf16>, vector<8x64xf32> -> vector<8x64xf32>
    %52 = arith.truncf %51 : vector<8x64xf32> to vector<8x64xbf16>
    %c64 = arith.constant 64 : index
    %c0_18 = arith.constant 0 : index
    %53 = vector.load %arg3[%c64, %c0_18] : memref<128x128xbf16, #tpu.memory_space<vmem>>, vector<64x128xbf16>
    %cst_19 = arith.constant dense<0.000000e+00> : vector<8x128xf32>
    %54 = tpu.matmul %52, %53, %cst_19 {dimension_numbers = #tpu.dot_dimension_numbers<[1], [0], [0], [1], [0, 0, 1, 1], [], []>} : vector<8x64xbf16>, vector<64x128xbf16>, vector<8x128xf32> -> vector<8x128xf32>
    %55 = arith.addf %30, %54 : vector<8x128xf32>
    %c0_20 = arith.constant 0 : index
    %c0_21 = arith.constant 0 : index
    %56 = vector.load %arg4[%c0_20, %c0_21] : memref<1x128xf32, #tpu.memory_space<vmem>>, vector<1x128xf32>
    %57 = vector.shape_cast %56 : vector<1x128xf32> to vector<128xf32>
    %58 = vector.shape_cast %57 : vector<128xf32> to vector<1x128xf32>
    %59 = vector.broadcast %58 : vector<1x128xf32> to vector<8x128xf32>
    %60 = arith.addf %55, %59 : vector<8x128xf32>
    %c0_22 = arith.constant 0 : index
    %c0_23 = arith.constant 0 : index
    %c0_24 = arith.constant 0 : index
    %61 = vector.load %arg5[%c0_22, %c0_23, %c0_24] : memref<1x8x128xf32, #tpu.memory_space<vmem>>, vector<1x8x128xf32>
    %62 = vector.shape_cast %61 : vector<1x8x128xf32> to vector<8x128xf32>
    %63 = vector.shape_cast %60 : vector<8x128xf32> to vector<1x8x128xf32>
    tpu.vector_store %arg5[%c0_22, %c0_23, %c0_24], %63 {strides = array<i32>} : memref<1x8x128xf32, #tpu.memory_space<vmem>>, vector<1x8x128xf32>,
    return
  }
  func.func @transform_0(%arg0: i32) -> (i32, i32, i32) {
    %c0_i32 = arith.constant 0 : i32
    %c0_i32_0 = arith.constant 0 : i32
    %c0_i32_1 = arith.constant 0 : i32
    return %arg0, %c0_i32, %c0_i32_0 : i32, i32, i32
  }
  func.func @transform_1(%arg0: i32) -> (i32, i32) {
    %c0_i32 = arith.constant 0 : i32
    %c0_i32_0 = arith.constant 0 : i32
    %c0_i32_1 = arith.constant 0 : i32
    return %c0_i32, %c0_i32_0 : i32, i32
  }
  func.func @transform_2(%arg0: i32) -> (i32, i32) {
    %c0_i32 = arith.constant 0 : i32
    %c0_i32_0 = arith.constant 0 : i32
    %c0_i32_1 = arith.constant 0 : i32
    return %c0_i32, %c0_i32_0 : i32, i32
  }
  func.func @transform_3(%arg0: i32) -> (i32, i32) {
    %c0_i32 = arith.constant 0 : i32
    %c0_i32_0 = arith.constant 0 : i32
    %c0_i32_1 = arith.constant 0 : i32
    return %c0_i32, %c0_i32_0 : i32, i32
  }
  func.func @transform_4(%arg0: i32) -> (i32, i32, i32) {
    %c0_i32 = arith.constant 0 : i32
    %c0_i32_0 = arith.constant 0 : i32
    %c0_i32_1 = arith.constant 0 : i32
    return %arg0, %c0_i32, %c0_i32_0 : i32, i32, i32
  }
}

</mosaic_0001>

<bundles_post_ra>
// kernel: tpu_custom_call.1
= control target key start
LH: loop header
LB: loop body
LE: loop exit
PB: predicated region body
PF: predicated region fallthrough
CT: control target
= control target key end

     0   :  { %9 = vsyncpa [#allocation3], 0  ;;  %s1732_s0 = inlined_call_operand.hbm [shape: f32[2,8,128], index: 0, kind: input, shape index: {}]   ;;  %s1733_s1 = inlined_call_operand.hbm [shape: bf16[128,384], index: 1, kind: input, shape index: {}]   ;;  %s1734_s2 = inlined_call_operand.hbm [shape: bf16[128,128], index: 2, kind: input, shape index: {}]   ;;  %s1735_s3 = inlined_call_operand.vmem [shape: f32[1,128], index: 3, kind: input, shape index: {}]   ;;  %s1736_s4 = inlined_call_operand.hbm [shape: f32[2,8,128], index: 4, kind: output, shape index: {}]  }
   0x1   :  { %11 = vsyncpa [#allocation3 + $0x1], 0 }
   0x2   :  { %12 = vsyncpa [#allocation6], 0 }
   0x3   :  { %13 = vsyncpa [#allocation4], 0 }
   0x4   :  { %15 = vsyncpa [#allocation4 + $0x1], 0  ;;  %s1442_s15 = smov 0   ;;  %s1444_s16 = smov 0  }
   0x5   :  { %s1446_s17 = smov 0   ;;  %s1448_s18 = smov 0  }
   0x6 LB: > { %s1463_s19 = sadd.s32 4294967295, %s1403_s18   ;;  %s974_s20 = sadd.s32 4294967294, %s1403_s18   ;;  %s1403_s18 = sphi %s1448_s18, %s1756_s18   ;;  %s1399_s17 = sphi %s1446_s17, %s1755_s17   ;;  %s1395_s16 = sphi %s1444_s16, %s1754_s16   ;;  %s1391_s15 = sphi %s1442_s15, %s1753_s15  }
   0x7   : > { %p41_p0 = scmp.ne.s32.totalorder %s1395_s16, %s1391_s15  ;;  %p1737_p1 = scmp.eq.s32.totalorder %s1463_s19, 0 }
   0x8   : > { %p134_p3 = scmp.eq.s32.totalorder %s974_s20, 1  ;;  %p975_p5 = scmp.ge.s32.totalorder %s1403_s18, 1 }
   0x9   : > { %p1472_p4 = por %p1737_p1, %p41_p0  ;;  %p141_p7 = scmp.lt.s32.totalorder %s1403_s18, 3 }
   0xa   : > { %p1477_p6 = por %p134_p3, %p41_p0  ;;  %s1405_s24 = smov [#allocation5]  }
   0xb   : > { %s1740_s21 = scalar_select %p1472_p4, 1, 0 }
   0xc   : > { %s1741_s22 = scalar_select %p1477_p6, 1, 0 }
   0xd   : > { %p1482_p8 = pnand %p975_p5, %p141_p7  ;;  %s153_s25 = sshll.u32 %s1405_s24, 4  ;;  %s1486_s25 = int_to_ptr.vmem [resolvable:$true] %s153_s25 }
   0xe   : > { %s1406_s27 = smov [#allocation7]   ;;  %s1247_s5 = scalar_lea.hbm %s1733_s1, 3072 }
   0xf   : > { %p1136_p9 = pneg %p1482_p8  ;;  %s166_s28 = sshll.u32 %s1406_s27, 4  ;;  %s1497_s28 = int_to_ptr.vmem [resolvable:$true] %s166_s28 }
  0x10   : > { %p1248_p12 = scmp.ne.s32.totalorder %s1733_s1, %s1247_s5  ;;  %p1254_p5 = scmp.lt.u32.totalorder %s1247_s5, %s1733_s1 }
  0x11   : > { %p1493_p11 = pnand %p1136_p9, %p1737_p1 }
  0x13   : > { %p1249_p13 = pneg %p1493_p11 }
  0x15   : > { %p1250_p0 = pnand %p1249_p13, %p1248_p12 }
  0x17   : > { %p1251_p3 = pneg %p1250_p0 }
  0x19   : > { %p1256_p7 = pnand %p1254_p5, %p1251_p3 }
  0x1b   : > { %1259 = shalt.err (!%p1256_p7)
}
  0x1c   : > { %s1260_s10 = scalar_lea.vmem %s1486_s25, 3072  ;;  %p1268_p2 = scmp.lt.s32.totalorder %s1486_s25, %s1486_s25 }
  0x1d   : > { %p1261_p9 = scmp.ne.s32.totalorder %s1486_s25, %s1260_s10  ;;  %p1269_p12 = scmp.lt.s32.totalorder %s1260_s10, %s1260_s10 }
  0x1f   : > { %p1263_p10 = pnand %p1261_p9, %p1249_p13  ;;  %p1270_p0 = por %p1269_p12, %p1268_p2 }
  0x21   : > { %p1264_p1 = pneg %p1263_p10 }
  0x23   : > { %p1271_p6 = pnand %p1270_p0, %p1264_p1 }
  0x25   : > { %1274 = shalt.err (!%p1271_p6)
}
  0x26   : > { %s1407_s11 = smov 192   ;;  %s1408_s12 = smov 12  }
  0x27   : > { %1139 = dma.hbm_to_vmem [thread:$0]  (!%p1493_p11), %s1733_s1, 3072, %s1486_s25, [#allocation6], %s1407_s11, %s1407_s11, %s1408_s12  }
  0x28   : > { %s1275_s27 = scalar_lea.hbm %s1734_s2, 1024 }
  0x29   : > { %p1276_p2 = scmp.ne.s32.totalorder %s1734_s2, %s1275_s27  ;;  %p1282_p10 = scmp.lt.u32.totalorder %s1275_s27, %s1734_s2 }
  0x2b   : > { %p1278_p1 = pnand %p1276_p2, %p1249_p13 }
  0x2d   : > { %p1279_p6 = pneg %p1278_p1 }
  0x2f   : > { %p1284_p3 = pnand %p1282_p10, %p1279_p6 }
  0x31   : > { %1287 = shalt.err (!%p1284_p3)
}
  0x32   : > { %s1288_s25 = scalar_lea.vmem %s1497_s28, 1024  ;;  %p1296_p12 = scmp.lt.s32.totalorder %s1497_s28, %s1497_s28 }
  0x33   : > { %p1289_p5 = scmp.ne.s32.totalorder %s1497_s28, %s1288_s25  ;;  %p1297_p0 = scmp.lt.s32.totalorder %s1288_s25, %s1288_s25 }
  0x35   : > { %p1291_p7 = pnand %p1289_p5, %p1249_p13  ;;  %p1298_p2 = por %p1297_p0, %p1296_p12 }
  0x37   : > { %p1292_p9 = pneg %p1291_p7 }
  0x39   : > { %p1299_p1 = pnand %p1298_p2, %p1292_p9 }
  0x3b   : > { %1302 = shalt.err (!%p1299_p1)
}
  0x3c   : > { %s1409_s7 = smov 64   ;;  %s1410_s8 = smov 4  }
  0x3d   : > { %1142 = dma.hbm_to_vmem [thread:$0]  (!%p1493_p11), %s1734_s2, 1024, %s1497_s28, [#allocation6], %s1409_s7, %s1409_s7, %s1410_s8  }
  0x3e   : > { %s1552_s11 = sadd.s32 1, %s1403_s18   ;;  %s28_s13 = sadd.s32 1, %s1399_s17 }
  0x3f   : > { %s25_s12 = ssub.s32 %s1403_s18, %s1552_s11  ;;  %p35_p6 = scmp.ne.s32.totalorder %s1399_s17, %s1395_s16 }
  0x40   : > { %p26_p13 = scmp.eq.s32.totalorder %s25_s12, 0  ;;  %p36_p10 = scmp.eq.s32.totalorder %s1403_s18, 0 }
  0x41   : > { %p1744_p5 = scmp.eq.s32.totalorder %s1463_s19, 1  ;;  %p1153_p9 = scmp.lt.s32.totalorder %s1403_s18, 2 }
  0x42   : > { %s1561_s14 = scalar_select %p26_p13, %s1399_s17, %s28_s13  }
  0x43   : > { %p37_p3 = por %p36_p10, %p35_p6  ;;  %p1565_p7 = por %p1744_p5, %p35_p6 }
  0x44   : > { %s183_s26 = sand.u32 1, %s1399_s17   ;;  %s980_s28 = sshll.u32 %s1403_s18, 7 }
  0x45   : > { %s1745_s20 = scalar_select %p1565_p7, 1, 0 }
  0x46   : > { %s979_s24 = sshll.u32 %s183_s26, 3  ;;  %s1575_s30 = scalar_lea.hbm %s1732_s0, %s980_s28 }
  0x47   : > { %s187_s5 = scalar_lea.vmem [#allocation2], %s979_s24  ;;  %p1579_p11 = pnand %p1153_p9, %p37_p3 }
  0x48   : > { %s194_s6 = sshll.u32 %s187_s5, 4  ;;  %s184_s7 = scalar_lea.sflag [#allocation3], %s183_s26  ;;  %s1577_s6 = int_to_ptr.vmem [resolvable:$true] %s194_s6 }
  0x49   : > { %s1303_s8 = scalar_lea.hbm %s1575_s30, 128  ;;  %p1305_p0 = pneg %p1579_p11 }
  0x4a   : > { %p1304_p12 = scmp.ne.s32.totalorder %s1575_s30, %s1303_s8  ;;  %s1308_s12 = scalar_lea.hbm %s1732_s0, 256 }
  0x4b   : > { %p1309_p13 = scmp.lt.u32.totalorder %s1575_s30, %s1732_s0  ;;  %p1310_p6 = scmp.lt.u32.totalorder %s1308_s12, %s1303_s8 }
  0x4c   : > { %p1306_p2 = pnand %p1305_p0, %p1304_p12  ;;  %p1312_p3 = scmp.lt.u32.totalorder %s1303_s8, %s1575_s30 }
  0x4d   : > { %p1311_p10 = por %p1310_p6, %p1309_p13 }
  0x4e   : > { %p1307_p1 = pneg %p1306_p2 }
  0x4f   : > { %p1313_p5 = por %p1312_p3, %p1311_p10 }
  0x51   : > { %p1314_p9 = pnand %p1313_p5, %p1307_p1 }
  0x53   : > { %1317 = shalt.err (!%p1314_p9)
}
  0x54   : > { %s1318_s26 = scalar_lea.vmem %s1577_s6, 128  ;;  %s1411_s28 = smov [#allocation2]  }
  0x55   : > { %p1319_p12 = scmp.ne.s32.totalorder %s1577_s6, %s1318_s26  ;;  %s1323_s27 = sshll.u32 %s1411_s28, 4  ;;  %s1324_s27 = int_to_ptr.vmem [resolvable:$false] %s1323_s27 }
  0x56   : > { %s1325_s29 = scalar_lea.vmem %s1324_s27, 256  ;;  %p1326_p4 = scmp.lt.s32.totalorder %s1577_s6, %s1324_s27 }
  0x57   : > { %p1321_p2 = pnand %p1319_p12, %p1305_p0  ;;  %p1327_p13 = scmp.lt.s32.totalorder %s1325_s29, %s1318_s26 }
  0x59   : > { %p1322_p7 = pneg %p1321_p2  ;;  %p1328_p6 = por %p1327_p13, %p1326_p4 }
  0x5b   : > { %p1329_p10 = pnand %p1328_p6, %p1322_p7 }
  0x5d   : > { %1332 = shalt.err (!%p1329_p10)
}
  0x5e   : > { %1146 = dma.hbm_to_vmem [thread:$0]  (!%p1579_p11), %s1575_s30, 128, %s1577_s6, %s184_s7  }
  0x5f   : > { %203 = sbr.rel (%p1482_p8) target bundleno = 1449 (0x5a9), region = 36  ;;  %s1611_s5 = sand.u32 (!%p1482_p8), 1, %s1395_s16  }
  0x60   : > { %s982_s8 = sshll.u32 (!%p1482_p8), %s1611_s5, 3  ;;  %s206_s9 = scalar_lea.sflag (!%p1482_p8), [#allocation3], %s1611_s5 }
  0x61   : > { %s1617_s10 = scalar_lea.vmem (!%p1482_p8), [#allocation2], %s982_s8  ;;  %p1747_p4 = scmp.ne.s32.totalorder (!%p1482_p8), %s1740_s21, 0 }
  0x66   : > { %1378 = dma.done.wait (%p1747_p4), %s206_s9, 128  }
  0x67   : > { %1380 = vsyncadd (%p1747_p4), %s206_s9, 4294967168  ;;  %p1748_p7 = scmp.eq.s32.totalorder %s1463_s19, 0 }
  0x69   : > { %1382 = dma.done.wait (%p1748_p7), [#allocation6], 4096   ;;  %p1749_p8 = pmov %p1748_p7 }
  0x6a   : > { %v1412_v0 = vmov 0   ;;  %v1199_v1 = vld [vmem:[#allocation5 + $0x4] ss:$12 sps:$4 sm:$0xff]   ;;  %v1201_v2 = vld [vmem:[#allocation5] ss:$12 sps:$4 sm:$0xff]   ;;  %v1413_v19 = vmov 0.0  }
  0x6b   : > { %1384 = vsyncadd (%p1749_p8), [#allocation6], 4294963200  ;;  %437 = vmatprep.mubr.bf16.mxu0 %v1412_v0  ;;  %405 = vmatprep.subr.bf16.mxu0 %v1199_v1  ;;  %v1202_v3 = vld [vmem:[#allocation5 + $0x1c] ss:$12 sps:$4 sm:$0xff]   ;;  %v1204_v4 = vld [vmem:[#allocation5 + $0x18] ss:$12 sps:$4 sm:$0xff]  }
  0x6c   : > { %406 = vmatpush1.bf16.msra.mxu0 %v1201_v2  ;;  %v1205_v5 = vld [vmem:[#allocation5 + $0x34] ss:$12 sps:$4 sm:$0xff]   ;;  %v1207_v6 = vld [vmem:[#allocation5 + $0x30] ss:$12 sps:$4 sm:$0xff]   ;;  %v1208_v7 = vld [vmem:[#allocation5 + $0x4c] ss:$12 sps:$4 sm:$0xff]   ;;  %1056 = vmatprep.subr.bf16.mxu1 %v1413_v19 }
  0x6d   : > { %407 = vmatprep.subr.bf16.mxu0 %v1202_v3  ;;  %v1210_v8 = vld [vmem:[#allocation5 + $0x48] ss:$12 sps:$4 sm:$0xff]   ;;  %v1211_v9 = vld [vmem:[#allocation5 + $0x64] ss:$12 sps:$4 sm:$0xff]   ;;  %v1213_v10 = vld [vmem:[#allocation5 + $0x60] ss:$12 sps:$4 sm:$0xff]  }
  0x6e   : > { %v1214_v11 = vld [vmem:[#allocation5 + $0x7c] ss:$12 sps:$4 sm:$0xff]   ;;  %v1216_v12 = vld [vmem:[#allocation5 + $0x78] ss:$12 sps:$4 sm:$0xff]   ;;  %v1217_v13 = vld [vmem:[#allocation5 + $0x94] ss:$12 sps:$4 sm:$0xff]  }
  0x6f   : > { %v1219_v14 = vld [vmem:[#allocation5 + $0x90] ss:$12 sps:$4 sm:$0xff]   ;;  %v1220_v15 = vld [vmem:[#allocation5 + $0xac] ss:$12 sps:$4 sm:$0xff]   ;;  %v1222_v16 = vld [vmem:[#allocation5 + $0xa8] ss:$12 sps:$4 sm:$0xff]  }
  0x70   : > { %408 = vmatpush1.bf16.msra.mxu0 %v1204_v4  ;;  %v243_v17 = vld [vmem:[%s1617_s10] sm:$0xff]  ;;  %vm1414_vm0 = vmmov 0   ;;  %vm490_vm1 = vcmask 523264   ;;  %s1415_s21 = smov 64   ;;  %v1224_v29 = vld [vmem:[#allocation5 + $0x20] ss:$12 sps:$4 sm:$0xff]  }
  0x71   : > { %409 = vmatprep.subr.bf16.mxu0 %v1205_v5  ;;  %v244_v18 = vpack.c.bf16 %v243_v17, %v243_v17  ;;  %1072 = vmatprep.mubr.msk.bf16.mxu1 %vm1414_vm0, %v1413_v19  ;;  %v1223_v28 = vld [vmem:[#allocation5 + $0x8] ss:$12 sps:$4 sm:$0xff]   ;;  %v1225_v30 = vld [vmem:[#allocation5 + $0x38] ss:$12 sps:$4 sm:$0xff]   ;;  %v1226_v31 = vld [vmem:[#allocation5 + $0x50] ss:$12 sps:$4 sm:$0xff]  }
  0x72   : > { %1057 = vmatpush3.bf16.msra.mxu1 %v1223_v28  ;;  %v1227_v32 = vld [vmem:[#allocation5 + $0x68] ss:$12 sps:$4 sm:$0xff]   ;;  %v1228_v33 = vld [vmem:[#allocation5 + $0x80] ss:$12 sps:$4 sm:$0xff]   ;;  %v1229_v36 = vld [vmem:[#allocation5 + $0x98] ss:$12 sps:$4 sm:$0xff]  }
  0x73   : > { %1058 = vmatprep.subr.bf16.mxu1 %v1413_v19  ;;  %v1230_v37 = vld [vmem:[#allocation5 + $0xb0] ss:$12 sps:$4 sm:$0xff]   ;;  %vm537_vm2 = vcmask 64512   ;;  %vm553_vm3 = vcmask 1043456   ;;  %v1235_v5 = vld [vmem:[#allocation7 + $0x20] sm:$0xff]   ;;  %s1026_s6 = sshll.u32 %s1463_s19, 7 }
  0x74   : > { %410 = vmatpush1.bf16.msra.mxu0 %v1207_v6  ;;  %v1236_v6 = vld [vmem:[#allocation7 + $0x28] sm:$0xff]   ;;  %v1234_v17 = vld [vmem:[#allocation7 + $0x18] sm:$0xff]   ;;  %s241_s25 = scalar_lea.vmem [#allocation8], %s982_s8  ;;  %s1688_s24 = scalar_lea.hbm %s1736_s4, %s1026_s6 }
  0x75   : > { %411 = vmatprep.subr.bf16.mxu0 %v1208_v7  ;;  %v1237_v7 = vld [vmem:[#allocation7 + $0x30] sm:$0xff]   ;;  %s885_s7 = sshll.u32 %s241_s25, 4  ;;  %s872_s19 = scalar_lea.sflag [#allocation4], %s1611_s5  ;;  %s1690_s7 = int_to_ptr.vmem [resolvable:$true] %s885_s7 }
  0x76   : > { %1059 = vmatpush3.bf16.msra.mxu1 %v1224_v29  ;;  %s1333_s26 = scalar_lea.vmem %s1690_s7, 128  ;;  %p1750_p0 = scmp.ne.s32.totalorder %s1745_s20, 0 }
  0x77   : > { %1060 = vmatprep.subr.bf16.mxu1 %v1413_v19  ;;  %p1334_p11 = scmp.ne.s32.totalorder %s1690_s7, %s1333_s26  ;;  %s1416_s28 = smov [#allocation8]  }
  0x78   : > { %412 = vmatpush1.bf16.msra.mxu0 %v1210_v8  ;;  %s1337_s27 = sshll.u32 %s1416_s28, 4  ;;  %s1338_s27 = int_to_ptr.vmem [resolvable:$false] %s1337_s27 }
  0x79   : > { %413 = vmatprep.subr.bf16.mxu0 %v1211_v9  ;;  %p1335_p1 = pnand %p1334_p11, %p1750_p0  ;;  %s1339_s29 = scalar_lea.vmem %s1338_s27, 256 }
  0x7a   : > { %1061 = vmatpush3.bf16.msra.mxu1 %v1225_v30  ;;  %p1340_p5 = scmp.lt.s32.totalorder %s1690_s7, %s1338_s27  ;;  %p1341_p9 = scmp.lt.s32.totalorder %s1339_s29, %s1333_s26 }
  0x7b   : > { %1062 = vmatprep.subr.bf16.mxu1 %v1413_v19  ;;  %p1336_p3 = pneg %p1335_p1 }
  0x7c   : > { %414 = vmatpush1.bf16.msra.mxu0 %v1213_v10  ;;  %p1342_p12 = por %p1341_p9, %p1340_p5 }
  0x7d   : > { %415 = vmatprep.subr.bf16.mxu0 %v1214_v11 }
  0x7e   : > { %1063 = vmatpush3.bf16.msra.mxu1 %v1226_v31  ;;  %p1343_p2 = pnand %p1342_p12, %p1336_p3 }
  0x7f   : > { %1064 = vmatprep.subr.bf16.mxu1 %v1413_v19 }
  0x80   : > { %416 = vmatpush1.bf16.msra.mxu0 %v1216_v12 }
  0x81   : > { %417 = vmatprep.subr.bf16.mxu0 %v1217_v13  ;;  %v1231_v13 = vld [vmem:[#allocation7] sm:$0xff]  }
  0x82   : > { %1065 = vmatpush3.bf16.msra.mxu1 %v1227_v32 }
  0x83   : > { %1066 = vmatprep.subr.bf16.mxu1 %v1413_v19 }
  0x84   : > { %418 = vmatpush1.bf16.msra.mxu0 %v1219_v14 }
  0x85   : > { %419 = vmatprep.subr.bf16.mxu0 %v1220_v15  ;;  %v1232_v15 = vld [vmem:[#allocation7 + $0x8] sm:$0xff]  }
  0x86   : > { %1067 = vmatpush3.bf16.msra.mxu1 %v1228_v33 }
  0x87   : > { %1068 = vmatprep.subr.bf16.mxu1 %v1413_v19 }
  0x88   : > { %420 = vmatpush1.bf16.msra.mxu0 %v1222_v16  ;;  %v1233_v16 = vld [vmem:[#allocation7 + $0x10] sm:$0xff]  }
  0x89   : > { %1076 = vmatprep.subr.bf16.mxu0 %v1413_v19 }
  0x8a   : > { %1069 = vmatpush3.bf16.msra.mxu1 %v1229_v36 }
  0x8b   : > { %438 = vmatmul.mubr.bf16.vlgmr.msra.gmra.mrb[0].mxu0 %v244_v18  ;;  %1070 = vmatprep.subr.bf16.mxu1 %v1413_v19 }
  0x8c   : > { %1078 = vmatprep.mubr.msk.bf16.mxu0 %vm1414_vm0, %v1413_v19 }
  0x8e   : > { %1071 = vmatpush3.bf16.msra.mxu1 %v1230_v37 }
  0x8f   : > { %1082 = vmatprep.subr.bf16.mxu1 %v1413_v19 }
  0x91   : > { %1073 = vmatmul.mubr.bf16.vlgmr.msra.gmra.mrb[0].mxu1 %v244_v18  ;;  %v1238_v18 = vld [vmem:[#allocation7 + $0x38] sm:$0xff]  }
  0x92   : > { %1084 = vmatprep.mubr.msk.bf16.mxu1 %vm1414_vm0, %v1413_v19 }
 0x15e   : > { %v439_v20 = vpop.f32.mrb[0].mxu0 }
 0x15f   : > { %v441_v21 = vpop.f32.mrb[1].mxu0  ;;  %v486_v22 = vmul.f32 0.125, %v439_v20 }
 0x160   : > { %v488_v23 = vpack.c.bf16 %v441_v21, %v441_v21  ;;  %v443_v24 = vpop.f32.mrb[2].mxu0 }
 0x161   : > { %v444_v25 = vpop.f32.mrb[3].mxu0  ;;  %v487_v27 = vpack.c.bf16 %v486_v22, %v486_v22 }
 0x162   : > { %v495_v26 = vsel %vm490_vm1, %v488_v23, 0  ;;  %610 = vrot.lane.b32.xlu0 %v488_v23, %s1415_s21 }
 0x163   : > { %1077 = vmatpush3.bf16.xpose.msra.mxu0 %v495_v26 }
 0x164   : > { %1088 = vmatprep.subr.bf16.mxu0 %v1413_v19  ;;  %v480_v54 = vpop.f32.mrb[0].mxu1 }
 0x165   : > { %v1074_v55 = vpop.f32.mrb[1].mxu1  ;;  %v489_v58 = vpack.c.bf16 %v480_v54, %v480_v54 }
 0x166   : > { %607 = vrot.lane.b32.xlu0 %v487_v27, %s1415_s21  ;;  %v483_v56 = vpop.f32.mrb[2].mxu1 }
 0x167   : > { %v1075_v57 = vpop.f32.mrb[3].mxu1  ;;  %v555_v59 = vsel %vm553_vm3, %v489_v58, 0 }
 0x168   : > { %1083 = vmatpush3.bf16.msra.mxu1 %v555_v59 }
 0x169   : > { %1094 = vmatprep.subr.bf16.mxu1 %v1413_v19 }
 0x16a   : > { %1079 = vmatmul.mubr.msk.bf16.vlgmr.msra.gmra.mrb[4].mxu0 %vm490_vm1, %v487_v27 }
 0x16b   : > { %1090 = vmatprep.mubr.msk.bf16.mxu0 %vm1414_vm0, %v1413_v19 }
 0x1d4   : > { %v611_v34 = vpop.permute.xlu0 %610 }
 0x1d5   : > { %v616_v35 = vsel %vm490_vm1, %v611_v34, 0  ;;  %v1024_v34 = vld [vmem:[%s1735_s3] ss:$0 sm:$0xff] }
 0x1d6   : > { %1089 = vmatpush3.bf16.xpose.msra.mxu0 %v616_v35 }
 0x1d7   : > { %1100 = vmatprep.subr.bf16.mxu0 %v1413_v19 }
 0x1d8   : > { %v608_v38 = vpop.permute.xlu0 %607 }
 0x1dd   : > { %1091 = vmatmul.mubr.msk.bf16.vlgmr.msra.gmra.mrb[8].mxu0 %vm490_vm1, %v608_v38 }
 0x1de   : > { %1108 = vmatprep.mubr.msk.bf16.mxu0 %vm1414_vm0, %v1413_v19  ;;  %1101 = vmatpush3.bf16.msra.mxu0 %v1235_v5 }
 0x1df   : > { %1102 = vmatprep.subr.bf16.mxu0 %v1413_v19 }
 0x1e2   : > { %1103 = vmatpush3.bf16.msra.mxu0 %v1236_v6 }
 0x1e3   : > { %1104 = vmatprep.subr.bf16.mxu0 %v1413_v19 }
 0x1e6   : > { %1105 = vmatpush3.bf16.msra.mxu0 %v1237_v7 }
 0x1e7   : > { %1106 = vmatprep.subr.bf16.mxu0 %v1413_v19 }
 0x1ea   : > { %1107 = vmatpush3.bf16.msra.mxu0 %v1238_v18 }
 0x23d   : > { %v531_v39 = vpop.f32.mrb[4].mxu0 }
 0x23e   : > { %v1080_v40 = vpop.f32.mrb[5].mxu0  ;;  %v538_v41 = vsel %vm537_vm2, %v531_v39, -inf }
 0x23f   : > { %539 = vmax.xlane.f32.xlu1 %v538_v41  ;;  %v534_v42 = vpop.f32.mrb[6].mxu0 }
 0x240   : > { %v1081_v43 = vpop.f32.mrb[7].mxu0 }
 0x2b0   : > { %v652_v44 = vpop.f32.mrb[8].mxu0 }
 0x2b1   : > { %v1092_v45 = vpop.f32.mrb[9].mxu0  ;;  %v658_v46 = vsel %vm537_vm2, %v652_v44, -inf }
 0x2b2   : > { %659 = vmax.xlane.f32.xlu1 %v658_v46  ;;  %v655_v47 = vpop.f32.mrb[10].mxu0 }
 0x2b3   : > { %v1093_v48 = vpop.f32.mrb[11].mxu0 }
 0x2cc   : > { %v540_v49 = vpop.xlane.xlu1 %539 }
 0x2cd   : > { %v541_v50 = vsub.f32 %v531_v39, %v540_v49 }
 0x2cf   : > { %v542_v51 = vmul.f32 1.442695, %v541_v50 }
 0x2d1   : > { %1239 = vpow2.f32 %v542_v51 }
 0x2db   : > { %v1240_v52 = vpop.eup %1239 }
 0x2dc   : > { %v544_v53 = vsel %vm537_vm2, %v1240_v52, 0.0 }
 0x2dd   : > { %545 = vadd.xlane.f32.xlu0 %v544_v53 }
 0x33f   : > { %v660_v60 = vpop.xlane.xlu1 %659 }
 0x340   : > { %v661_v61 = vsub.f32 %v652_v44, %v660_v60 }
 0x342   : > { %v662_v62 = vmul.f32 1.442695, %v661_v61 }
 0x344   : > { %1241 = vpow2.f32 %v662_v62 }
 0x34e   : > { %v1242_v63 = vpop.eup %1241 }
 0x34f   : > { %v664_v0 = vsel %vm537_vm2, %v1242_v63, 0.0 }
 0x350   : > { %665 = vadd.xlane.f32.xlu1 %v664_v0 }
 0x361   : > { %671 = vrot.lane.b32.xlu1 %v489_v58, %s1415_s21 }
 0x36a   : > { %v546_v1 = vpop.xlane.xlu0 %545 }
 0x36b   : > { %1243 = vrcp.f32 %v546_v1 }
 0x375   : > { %v1244_v2 = vpop.eup %1243 }
 0x376   : > { %v548_v3 = vmul.f32 %v1244_v2, %v1240_v52 }
 0x378   : > { %v549_v4 = vpack.c.bf16 %v548_v3, %v548_v3 }
 0x37a   : > { %1085 = vmatmul.mubr.msk.bf16.vlgmr.msra.gmra.mrb[4].mxu1 %vm537_vm2, %v549_v4 }
 0x37b   : > { %1096 = vmatprep.mubr.msk.bf16.mxu1 %vm1414_vm0, %v1413_v19 }
 0x3dd   : > { %v666_v8 = vpop.xlane.xlu1 %665 }
 0x3de   : > { %1245 = vrcp.f32 %v666_v8 }
 0x3e1   : > { %v672_v9 = vpop.permute.xlu1 %671 }
 0x3e2   : > { %v677_v10 = vsel %vm553_vm3, %v672_v9, 0 }
 0x3e3   : > { %1095 = vmatpush3.bf16.msra.mxu1 %v677_v10 }
 0x3e4   : > { %1112 = vmatprep.subr.bf16.mxu1 %v1413_v19 }
 0x3e8   : > { %v1246_v11 = vpop.eup %1245 }
 0x3e9   : > { %v668_v12 = vmul.f32 %v1246_v11, %v1242_v63 }
 0x3eb   : > { %v669_v14 = vpack.c.bf16 %v668_v12, %v668_v12 }
 0x3ed   : > { %1097 = vmatmul.mubr.msk.bf16.vlgmr.msra.gmra.mrb[8].mxu1 %vm537_vm2, %v669_v14 }
 0x3ee   : > { %1113 = vmatpush3.bf16.msra.mxu1 %v1231_v13  ;;  %1120 = vmatprep.mubr.msk.bf16.mxu1 %vm1414_vm0, %v1413_v19 }
 0x3ef   : > { %1114 = vmatprep.subr.bf16.mxu1 %v1413_v19 }
 0x3f2   : > { %1115 = vmatpush3.bf16.msra.mxu1 %v1232_v15 }
 0x3f3   : > { %1116 = vmatprep.subr.bf16.mxu1 %v1413_v19 }
 0x3f6   : > { %1117 = vmatpush3.bf16.msra.mxu1 %v1233_v16 }
 0x3f7   : > { %1118 = vmatprep.subr.bf16.mxu1 %v1413_v19 }
 0x3fa   : > { %1119 = vmatpush3.bf16.msra.mxu1 %v1234_v17 }
 0x44d   : > { %v591_v20 = vpop.f32.mrb[4].mxu1 }
 0x44e   : > { %v597_v21 = vpack.c.bf16 %v591_v20, %v591_v20  ;;  %v1086_v22 = vpop.f32.mrb[5].mxu1 }
 0x44f   : > { %v594_v23 = vpop.f32.mrb[6].mxu1 }
 0x450   : > { %v1087_v24 = vpop.f32.mrb[7].mxu1  ;;  %1121 = vmatmul.mubr.msk.bf16.vlgmr.msra.gmra.mrb[12].mxu1 %vm490_vm1, %v597_v21 }
 0x4c0   : > { %v713_v25 = vpop.f32.mrb[8].mxu1 }
 0x4c1   : > { %v719_v26 = vpack.c.bf16 %v713_v25, %v713_v25  ;;  %v1098_v27 = vpop.f32.mrb[9].mxu1 }
 0x4c2   : > { %v716_v28 = vpop.f32.mrb[10].mxu1 }
 0x4c3   : > { %v1099_v29 = vpop.f32.mrb[11].mxu1  ;;  %1109 = vmatmul.mubr.msk.bf16.vlgmr.msra.gmra.mrb[12].mxu0 %vm490_vm1, %v719_v26 }
 0x523   : > { %v856_v19 = vpop.f32.mrb[12].mxu1 }
 0x524   : > { %v1122_v30 = vpop.f32.mrb[13].mxu1 }
 0x525   : > { %v859_v31 = vpop.f32.mrb[14].mxu1 }
 0x526   : > { %v1123_v32 = vpop.f32.mrb[15].mxu1 }
 0x596   : > { %v789_v33 = vpop.f32.mrb[12].mxu0 }
 0x597   : > { %v857_v35 = vadd.f32 %v856_v19, %v789_v33  ;;  %v1110_v36 = vpop.f32.mrb[13].mxu0 }
 0x598   : > { %v792_v37 = vpop.f32.mrb[14].mxu0 }
 0x599   : > { %v869_v38 = vadd.f32 %v1024_v34, %v857_v35  ;;  %v1111_v39 = vpop.f32.mrb[15].mxu0 }
 0x59b   : > { %870 = vst [vmem:[%s241_s25] sm:$0xff] %v869_v38 }
 0x59c   : > { %1346 = shalt.err (!%p1343_p2)
}
 0x59d   : > { %s1347_s5 = scalar_lea.hbm %s1688_s24, 128  ;;  %s1351_s10 = scalar_lea.hbm %s1736_s4, 256 }
 0x59e   : > { %p1348_p13 = scmp.ne.s32.totalorder %s1688_s24, %s1347_s5  ;;  %p1352_p4 = scmp.lt.u32.totalorder %s1688_s24, %s1736_s4 }
 0x59f   : > { %p1353_p7 = scmp.lt.u32.totalorder %s1351_s10, %s1347_s5  ;;  %p1355_p11 = scmp.lt.u32.totalorder %s1347_s5, %s1688_s24 }
 0x5a0   : > { %p1349_p6 = pnand %p1348_p13, %p1750_p0 }
 0x5a1   : > { %p1354_p8 = por %p1353_p7, %p1352_p4 }
 0x5a2   : > { %p1350_p10 = pneg %p1349_p6 }
 0x5a3   : > { %p1356_p1 = por %p1355_p11, %p1354_p8 }
 0x5a5   : > { %p1357_p3 = pnand %p1356_p1, %p1350_p10 }
 0x5a7   : > { %1360 = shalt.err (!%p1357_p3)
}
 0x5a8   : > { %1134 = dma.vmem_to_hbm [thread:$0]  (%p1750_p0), %s1690_s7, 128, %s1688_s24, %s872_s19  }
 0x5a9 PF: > { %s897_s30 = sand.u32 1, %s1391_s15   ;;  %p1751_p5 = scmp.ne.s32.totalorder %s1741_s22, 0 }
 0x5aa   : > { %p1752_p9 = scmp.ge.s32.totalorder %s1403_s18, 2  ;;  %s898_s6 = scalar_lea.sflag [#allocation4], %s897_s30 }
 0x5ac   : > { %p1148_p12 = pnand %p1752_p9, %p1751_p5 }
 0x5ae   : > { %1386 = dma.done.wait (!%p1148_p12), %s898_s6, 128  }
 0x5af   : > { %1388 = vsyncadd (!%p1148_p12), %s898_s6, 4294967168  ;;  %p18_p2 = scmp.ge.s32.totalorder %s1552_s11, 4   ;;  %s1753_s15 = smov %s1395_s16 }
 0x5b0   : > { %s1754_s16 = smov %s1399_s17  ;;  %s1755_s17 = smov %s1561_s14 }
 0x5b1   : > { %s1756_s18 = smov %s1552_s11  ;;  %20 = sbr.rel (!%p18_p2) target bundleno = 6 (0x6), region = 89 }
 0x5b8   :  { %903 = vsyncpa [#allocation3], 1 }
 0x5b9   :  { %905 = vsyncpa [#allocation3 + $0x1], 1 }
 0x5ba   :  { %906 = vsyncpa [#allocation6], 1 }
 0x5bb   :  { %907 = vsyncpa [#allocation4], 1 }
 0x5bc   :  { %909 = vsyncpa [#allocation4 + $0x1], 1 }

</bundles_post_ra>
